<compile_context>
chip_gen: v5e
topology: v5e:2x2
jax: 0.10.0
libtpu: 0.0.40
codegen_flags: <defaults>
</compile_context>

<pallas_src>
import math

import jax
import jax.numpy as jnp
import numpy as np
from jax.experimental import pallas as pl
from jax.experimental.pallas import tpu as pltpu

D_MODEL = 32
NUM_HEADS = 4
D_K = D_MODEL // NUM_HEADS


def _mha_kernel(xq_ref, xk_ref, xv_ref,
                wq_ref, bq_ref, wk_ref, bk_ref, wv_ref, bv_ref,
                wo_ref, bo_ref, out_ref):
    H, dk = NUM_HEADS, D_K
    S, D = xq_ref.shape  # per-batch (S, D) block (batch dim squeezed by BlockSpec)

    # Head-major projections: weights are pre-arranged to (H, D, d_k) on the host, so a
    # single batched einsum produces q/k/v directly in (H, S, d_k) layout — no in-kernel
    # reshape/transpose of activations, no per-head lane slicing later.
    xq3 = jnp.broadcast_to(xq_ref[...], (H, S, D))
    xk3 = jnp.broadcast_to(xk_ref[...], (H, S, D))
    xv3 = jnp.broadcast_to(xv_ref[...], (H, S, D))
    q = jnp.einsum("hsd,hdk->hsk", xq3, wq_ref[...],
                   preferred_element_type=jnp.float32) + bq_ref[...]   # scale pre-folded
    k = jnp.einsum("hsd,hdk->hsk", xk3, wk_ref[...],
                   preferred_element_type=jnp.float32) + bk_ref[...]
    v = jnp.einsum("hsd,hdk->hsk", xv3, wv_ref[...],
                   preferred_element_type=jnp.float32) + bv_ref[...]

    # All heads' scores in one batched matmul; one softmax chain for all heads (f32).
    s = jnp.einsum("hqd,hkd->hqk", q, k, preferred_element_type=jnp.float32)   # (H, S, S)
    s = s - jnp.max(s, axis=-1, keepdims=True)
    p = jnp.exp(s)
    p = p / jnp.sum(p, axis=-1, keepdims=True)        # exact division; EUP has slack

    ctx = jnp.einsum("hqk,hkd->hqd", p, v, preferred_element_type=jnp.float32)  # (H, S, dk)

    # Fold every head through its slice of the output projection (W_o pre-arranged as
    # (H, d_k, D)) and reduce over heads — the (S, D) context is never re-assembled.
    out_h = jnp.einsum("hsk,hkD->hsD", ctx, wo_ref[...],
                       preferred_element_type=jnp.float32)                      # (H, S, D)
    out_ref[...] = (jnp.sum(out_h, axis=0) + bo_ref[...]).astype(out_ref.dtype)


def prepare_params(params):
    """One-time repack of PyTorch-layout Linear params into kernel-ready head-major
    layouts.  Call this ONCE outside the hot path; only the result is fed per step."""
    wq, bq, wk, bk, wv, bv, wo, bo = params
    H, dk, D = NUM_HEADS, D_K, D_MODEL
    scale = 1.0 / math.sqrt(dk)

    def head_major(w, b, s=1.0):
        # nn.Linear weight is [out, in] -> [in, out] -> split out dim per head -> (H, D, d_k)
        w3 = (w.T * s).reshape(D, H, dk).transpose(1, 0, 2)
        b3 = (b * s).reshape(H, 1, dk)
        return w3.astype(jnp.float32), b3.astype(jnp.float32)

    wq3, bq3 = head_major(wq, bq, scale)   # 1/sqrt(d_k) folded into W_q / b_q
    wk3, bk3 = head_major(wk, bk)
    wv3, bv3 = head_major(wv, bv)
    # Output projection: [out, in] -> [in, out] = (D, D); split the IN dim per head.
    wo3 = wo.T.reshape(H, dk, D).astype(jnp.float32)
    bo2 = bo.reshape(1, D).astype(jnp.float32)
    return (wq3, bq3, wk3, bk3, wv3, bv3, wo3, bo2)


@jax.jit
def mha_forward(input_q, input_k, input_v, prepped):
    B, S, D = input_q.shape
    assert D == D_MODEL
    H, dk = NUM_HEADS, D_K
    wq3, bq3, wk3, bk3, wv3, bv3, wo3, bo2 = prepped

    # Activations: one (S, D) block per batch element (batch dim squeezed).
    act_spec = pl.BlockSpec((None, S, D), lambda b: (b, 0, 0))

    def full(shape):
        # Small weights/biases: full array resident in VMEM, same block every grid step.
        return pl.BlockSpec(shape, lambda b, _s=shape: (0,) * len(_s))

    out = pl.pallas_call(
        _mha_kernel,
        out_shape=jax.ShapeDtypeStruct((B, S, D), input_q.dtype),
        grid=(B,),
        in_specs=[
            act_spec, act_spec, act_spec,
            full((H, D, dk)), full((H, 1, dk)),
            full((H, D, dk)), full((H, 1, dk)),
            full((H, D, dk)), full((H, 1, dk)),
            full((H, dk, D)), full((1, D)),
        ],
        out_specs=pl.BlockSpec((None, S, D), lambda b: (b, 0, 0)),
        compiler_params=pltpu.CompilerParams(dimension_semantics=("parallel",)),
    )(input_q, input_k, input_v, wq3, bq3, wk3, bk3, wv3, bv3, wo3, bo2)
    return out


def reference_mha(input_q, input_k, input_v, params):
    wq, bq, wk, bk, wv, bv, wo, bo = params
    B, S, D = input_q.shape
    H, dk = NUM_HEADS, D_K

    def lin(x, w, b):
        return x @ w.T + b

    q = lin(input_q, wq, bq).reshape(B, S, H, dk).transpose(0, 2, 1, 3)
    k = lin(input_k, wk, bk).reshape(B, S, H, dk).transpose(0, 2, 1, 3)
    v = lin(input_v, wv, bv).reshape(B, S, H, dk).transpose(0, 2, 1, 3)
    scores = jnp.einsum("bhqd,bhkd->bhqk", q, k) / math.sqrt(dk)
    w = jax.nn.softmax(scores, axis=-1)
    out = jnp.einsum("bhqk,bhkd->bhqd", w, v).transpose(0, 2, 1, 3).reshape(B, S, D)
    return lin(out, wo, bo)


if __name__ == "__main__":
    key = jax.random.PRNGKey(0)
    ks = jax.random.split(key, 12)

    B, S = 2, 8
    input_q = jax.random.normal(ks[0], (B, S, D_MODEL), dtype=jnp.float32)
    input_k = jax.random.normal(ks[1], (B, S, D_MODEL), dtype=jnp.float32)
    input_v = jax.random.normal(ks[2], (B, S, D_MODEL), dtype=jnp.float32)

    def init_linear(kw, kb):
        bound = 1.0 / math.sqrt(D_MODEL)
        w = jax.random.uniform(kw, (D_MODEL, D_MODEL), jnp.float32, -bound, bound)
        b = jax.random.uniform(kb, (D_MODEL,), jnp.float32, -bound, bound)
        return w, b

    wq, bq = init_linear(ks[3], ks[4])
    wk, bk = init_linear(ks[5], ks[6])
    wv, bv = init_linear(ks[7], ks[8])
    wo, bo = init_linear(ks[9], ks[10])
    params = (wq, bq, wk, bk, wv, bv, wo, bo)

    # One-time weight repack outside the hot path (amortized across forward calls).
    prepped = prepare_params(params)

    out = mha_forward(input_q, input_k, input_v, prepped)
    out = jax.block_until_ready(out)

    ref = reference_mha(input_q, input_k, input_v, params)
    # Exact softmax division -> tight f32 tolerance (no approx-reciprocal slack needed).
    np.testing.assert_allclose(np.asarray(out), np.asarray(ref), rtol=1e-4, atol=1e-5)

    print("KERNEL_OK")
</pallas_src>

<mosaic_0001>
module attributes {stable_mosaic.version = 11 : i64} {
  func.func @_mha_kernel(%arg0: i32, %arg1: memref<1x8x32xf32, #tpu.memory_space<vmem>>, %arg2: memref<1x8x32xf32, #tpu.memory_space<vmem>>, %arg3: memref<1x8x32xf32, #tpu.memory_space<vmem>>, %arg4: memref<4x32x8xf32, #tpu.memory_space<vmem>>, %arg5: memref<4x1x8xf32, #tpu.memory_space<vmem>>, %arg6: memref<4x32x8xf32, #tpu.memory_space<vmem>>, %arg7: memref<4x1x8xf32, #tpu.memory_space<vmem>>, %arg8: memref<4x32x8xf32, #tpu.memory_space<vmem>>, %arg9: memref<4x1x8xf32, #tpu.memory_space<vmem>>, %arg10: memref<4x8x32xf32, #tpu.memory_space<vmem>>, %arg11: memref<1x32xf32, #tpu.memory_space<vmem>>, %arg12: memref<1x8x32xf32, #tpu.memory_space<vmem>>) attributes {dimension_semantics = [#tpu.dimension_semantics<parallel>], iteration_bounds = array<i64: 2>, scalar_prefetch = 0 : i64, scratch_operands = 0 : i64, tpu.core_type = #tpu.core_type<tc>, window_params = [{transform_indices = @transform_0, window_bounds = array<i64: 1, 8, 32>}, {transform_indices = @transform_1, window_bounds = array<i64: 1, 8, 32>}, {transform_indices = @transform_2, window_bounds = array<i64: 1, 8, 32>}, {pipeline_mode = #tpu.pipeline_mode<synchronous>, transform_indices = @transform_3, window_bounds = array<i64: 4, 32, 8>}, {pipeline_mode = #tpu.pipeline_mode<synchronous>, transform_indices = @transform_4, window_bounds = array<i64: 4, 1, 8>}, {pipeline_mode = #tpu.pipeline_mode<synchronous>, transform_indices = @transform_5, window_bounds = array<i64: 4, 32, 8>}, {pipeline_mode = #tpu.pipeline_mode<synchronous>, transform_indices = @transform_6, window_bounds = array<i64: 4, 1, 8>}, {pipeline_mode = #tpu.pipeline_mode<synchronous>, transform_indices = @transform_7, window_bounds = array<i64: 4, 32, 8>}, {pipeline_mode = #tpu.pipeline_mode<synchronous>, transform_indices = @transform_8, window_bounds = array<i64: 4, 1, 8>}, {pipeline_mode = #tpu.pipeline_mode<synchronous>, transform_indices = @transform_9, window_bounds = array<i64: 4, 8, 32>}, {pipeline_mode = #tpu.pipeline_mode<synchronous>, transform_indices = @transform_10, window_bounds = array<i64: 1, 32>}, {transform_indices = @transform_11, window_bounds = array<i64: 1, 8, 32>}]} {
    %c0 = arith.constant 0 : index
    %c0_0 = arith.constant 0 : index
    %c0_1 = arith.constant 0 : index
    %0 = vector.load %arg1[%c0, %c0_0, %c0_1] : memref<1x8x32xf32, #tpu.memory_space<vmem>>, vector<1x8x32xf32>
    %1 = vector.shape_cast %0 : vector<1x8x32xf32> to vector<8x32xf32>
    %2 = vector.shape_cast %1 : vector<8x32xf32> to vector<1x8x32xf32>
    %3 = vector.broadcast %2 : vector<1x8x32xf32> to vector<4x8x32xf32>
    %c0_2 = arith.constant 0 : index
    %c0_3 = arith.constant 0 : index
    %c0_4 = arith.constant 0 : index
    %4 = vector.load %arg2[%c0_2, %c0_3, %c0_4] : memref<1x8x32xf32, #tpu.memory_space<vmem>>, vector<1x8x32xf32>
    %5 = vector.shape_cast %4 : vector<1x8x32xf32> to vector<8x32xf32>
    %6 = vector.shape_cast %5 : vector<8x32xf32> to vector<1x8x32xf32>
    %7 = vector.broadcast %6 : vector<1x8x32xf32> to vector<4x8x32xf32>
    %c0_5 = arith.constant 0 : index
    %c0_6 = arith.constant 0 : index
    %c0_7 = arith.constant 0 : index
    %8 = vector.load %arg3[%c0_5, %c0_6, %c0_7] : memref<1x8x32xf32, #tpu.memory_space<vmem>>, vector<1x8x32xf32>
    %9 = vector.shape_cast %8 : vector<1x8x32xf32> to vector<8x32xf32>
    %10 = vector.shape_cast %9 : vector<8x32xf32> to vector<1x8x32xf32>
    %11 = vector.broadcast %10 : vector<1x8x32xf32> to vector<4x8x32xf32>
    %c0_8 = arith.constant 0 : index
    %c0_9 = arith.constant 0 : index
    %c0_10 = arith.constant 0 : index
    %12 = vector.load %arg4[%c0_8, %c0_9, %c0_10] : memref<4x32x8xf32, #tpu.memory_space<vmem>>, vector<4x32x8xf32>
    "tpu.trace_start"() <{level = 10 : i32, message = "hsd,hdk->hsk"}> : () -> ()
    %cst = arith.constant dense<0.000000e+00> : vector<4x8x8xf32>
    %13 = tpu.matmul %3, %12, %cst {dimension_numbers = #tpu.dot_dimension_numbers<[2], [1], [1], [2], [0, 0, 0, 1, 1, 2], [0], [0]>} : vector<4x8x32xf32>, vector<4x32x8xf32>, vector<4x8x8xf32> -> vector<4x8x8xf32>
    "tpu.trace_stop"() : () -> ()
    %c0_11 = arith.constant 0 : index
    %c0_12 = arith.constant 0 : index
    %c0_13 = arith.constant 0 : index
    %14 = vector.load %arg5[%c0_11, %c0_12, %c0_13] : memref<4x1x8xf32, #tpu.memory_space<vmem>>, vector<4x1x8xf32>
    %15 = vector.broadcast %14 : vector<4x1x8xf32> to vector<4x8x8xf32>
    %16 = arith.addf %13, %15 : vector<4x8x8xf32>
    %c0_14 = arith.constant 0 : index
    %c0_15 = arith.constant 0 : index
    %c0_16 = arith.constant 0 : index
    %17 = vector.load %arg6[%c0_14, %c0_15, %c0_16] : memref<4x32x8xf32, #tpu.memory_space<vmem>>, vector<4x32x8xf32>
    "tpu.trace_start"() <{level = 10 : i32, message = "hsd,hdk->hsk"}> : () -> ()
    %cst_17 = arith.constant dense<0.000000e+00> : vector<4x8x8xf32>
    %18 = tpu.matmul %7, %17, %cst_17 {dimension_numbers = #tpu.dot_dimension_numbers<[2], [1], [1], [2], [0, 0, 0, 1, 1, 2], [0], [0]>} : vector<4x8x32xf32>, vector<4x32x8xf32>, vector<4x8x8xf32> -> vector<4x8x8xf32>
    "tpu.trace_stop"() : () -> ()
    %c0_18 = arith.constant 0 : index
    %c0_19 = arith.constant 0 : index
    %c0_20 = arith.constant 0 : index
    %19 = vector.load %arg7[%c0_18, %c0_19, %c0_20] : memref<4x1x8xf32, #tpu.memory_space<vmem>>, vector<4x1x8xf32>
    %20 = vector.broadcast %19 : vector<4x1x8xf32> to vector<4x8x8xf32>
    %21 = arith.addf %18, %20 : vector<4x8x8xf32>
    %c0_21 = arith.constant 0 : index
    %c0_22 = arith.constant 0 : index
    %c0_23 = arith.constant 0 : index
    %22 = vector.load %arg8[%c0_21, %c0_22, %c0_23] : memref<4x32x8xf32, #tpu.memory_space<vmem>>, vector<4x32x8xf32>
    "tpu.trace_start"() <{level = 10 : i32, message = "hsd,hdk->hsk"}> : () -> ()
    %cst_24 = arith.constant dense<0.000000e+00> : vector<4x8x8xf32>
    %23 = tpu.matmul %11, %22, %cst_24 {dimension_numbers = #tpu.dot_dimension_numbers<[2], [1], [1], [2], [0, 0, 0, 1, 1, 2], [0], [0]>} : vector<4x8x32xf32>, vector<4x32x8xf32>, vector<4x8x8xf32> -> vector<4x8x8xf32>
    "tpu.trace_stop"() : () -> ()
    %c0_25 = arith.constant 0 : index
    %c0_26 = arith.constant 0 : index
    %c0_27 = arith.constant 0 : index
    %24 = vector.load %arg9[%c0_25, %c0_26, %c0_27] : memref<4x1x8xf32, #tpu.memory_space<vmem>>, vector<4x1x8xf32>
    %25 = vector.broadcast %24 : vector<4x1x8xf32> to vector<4x8x8xf32>
    %26 = arith.addf %23, %25 : vector<4x8x8xf32>
    "tpu.trace_start"() <{level = 10 : i32, message = "hqd,hkd->hqk"}> : () -> ()
    %cst_28 = arith.constant dense<0.000000e+00> : vector<4x8x8xf32>
    %27 = tpu.matmul %16, %21, %cst_28 {dimension_numbers = #tpu.dot_dimension_numbers<[2], [2], [1], [1], [0, 0, 0, 1, 1, 1], [0], [0]>} : vector<4x8x8xf32>, vector<4x8x8xf32>, vector<4x8x8xf32> -> vector<4x8x8xf32>
    "tpu.trace_stop"() : () -> ()
    %cst_29 = arith.constant dense<0xFF800000> : vector<4x8xf32>
    %28 = vector.multi_reduction <maximumf>, %27, %cst_29 [2] : vector<4x8x8xf32> to vector<4x8xf32>
    %29 = vector.shape_cast %28 : vector<4x8xf32> to vector<4x8x1xf32>
    %30 = vector.broadcast %29 : vector<4x8x1xf32> to vector<4x8x8xf32>
    %31 = arith.subf %27, %30 : vector<4x8x8xf32>
    %32 = math.exp %31 : vector<4x8x8xf32>
    %cst_30 = arith.constant dense<0.000000e+00> : vector<4x8xf32>
    %33 = vector.multi_reduction <add>, %32, %cst_30 [2] : vector<4x8x8xf32> to vector<4x8xf32>
    %34 = vector.shape_cast %33 : vector<4x8xf32> to vector<4x8x1xf32>
    %35 = vector.broadcast %34 : vector<4x8x1xf32> to vector<4x8x8xf32>
    %36 = arith.divf %32, %35 : vector<4x8x8xf32>
    "tpu.trace_start"() <{level = 10 : i32, message = "hqk,hkd->hqd"}> : () -> ()
    %cst_31 = arith.constant dense<0.000000e+00> : vector<4x8x8xf32>
    %37 = tpu.matmul %36, %26, %cst_31 {dimension_numbers = #tpu.dot_dimension_numbers<[2], [1], [1], [2], [0, 0, 0, 1, 1, 2], [0], [0]>} : vector<4x8x8xf32>, vector<4x8x8xf32>, vector<4x8x8xf32> -> vector<4x8x8xf32>
    "tpu.trace_stop"() : () -> ()
    %c0_32 = arith.constant 0 : index
    %c0_33 = arith.constant 0 : index
    %c0_34 = arith.constant 0 : index
    %38 = vector.load %arg10[%c0_32, %c0_33, %c0_34] : memref<4x8x32xf32, #tpu.memory_space<vmem>>, vector<4x8x32xf32>
    "tpu.trace_start"() <{level = 10 : i32, message = "hsk,hkD->hsD"}> : () -> ()
    %cst_35 = arith.constant dense<0.000000e+00> : vector<4x8x32xf32>
    %39 = tpu.matmul %37, %38, %cst_35 {dimension_numbers = #tpu.dot_dimension_numbers<[2], [1], [1], [2], [0, 0, 0, 1, 1, 2], [0], [0]>} : vector<4x8x8xf32>, vector<4x8x32xf32>, vector<4x8x32xf32> -> vector<4x8x32xf32>
    "tpu.trace_stop"() : () -> ()
    %cst_36 = arith.constant dense<0.000000e+00> : vector<8x32xf32>
    %40 = vector.multi_reduction <add>, %39, %cst_36 [0] : vector<4x8x32xf32> to vector<8x32xf32>
    %c0_37 = arith.constant 0 : index
    %c0_38 = arith.constant 0 : index
    %41 = vector.load %arg11[%c0_37, %c0_38] : memref<1x32xf32, #tpu.memory_space<vmem>>, vector<1x32xf32>
    %42 = vector.broadcast %41 : vector<1x32xf32> to vector<8x32xf32>
    %43 = arith.addf %40, %42 : vector<8x32xf32>
    %c0_39 = arith.constant 0 : index
    %c0_40 = arith.constant 0 : index
    %c0_41 = arith.constant 0 : index
    %44 = vector.load %arg12[%c0_39, %c0_40, %c0_41] : memref<1x8x32xf32, #tpu.memory_space<vmem>>, vector<1x8x32xf32>
    %45 = vector.shape_cast %44 : vector<1x8x32xf32> to vector<8x32xf32>
    %46 = vector.shape_cast %43 : vector<8x32xf32> to vector<1x8x32xf32>
    tpu.vector_store %arg12[%c0_39, %c0_40, %c0_41], %46 {strides = array<i32>} : memref<1x8x32xf32, #tpu.memory_space<vmem>>, vector<1x8x32xf32>,
    return
  }
  func.func @transform_0(%arg0: i32) -> (i32, i32, i32) {
    %c0_i32 = arith.constant 0 : i32
    %c0_i32_0 = arith.constant 0 : i32
    %c0_i32_1 = arith.constant 0 : i32
    return %arg0, %c0_i32, %c0_i32_0 : i32, i32, i32
  }
  func.func @transform_1(%arg0: i32) -> (i32, i32, i32) {
    %c0_i32 = arith.constant 0 : i32
    %c0_i32_0 = arith.constant 0 : i32
    %c0_i32_1 = arith.constant 0 : i32
    return %arg0, %c0_i32, %c0_i32_0 : i32, i32, i32
  }
  func.func @transform_2(%arg0: i32) -> (i32, i32, i32) {
    %c0_i32 = arith.constant 0 : i32
    %c0_i32_0 = arith.constant 0 : i32
    %c0_i32_1 = arith.constant 0 : i32
    return %arg0, %c0_i32, %c0_i32_0 : i32, i32, i32
  }
  func.func @transform_3(%arg0: i32) -> (i32, i32, i32) {
    %c0_i32 = arith.constant 0 : i32
    %c0_i32_0 = arith.constant 0 : i32
    %c0_i32_1 = arith.constant 0 : i32
    %c0_i32_2 = arith.constant 0 : i32
    return %c0_i32, %c0_i32_0, %c0_i32_1 : i32, i32, i32
  }
  func.func @transform_4(%arg0: i32) -> (i32, i32, i32) {
    %c0_i32 = arith.constant 0 : i32
    %c0_i32_0 = arith.constant 0 : i32
    %c0_i32_1 = arith.constant 0 : i32
    %c0_i32_2 = arith.constant 0 : i32
    return %c0_i32, %c0_i32_0, %c0_i32_1 : i32, i32, i32
  }
  func.func @transform_5(%arg0: i32) -> (i32, i32, i32) {
    %c0_i32 = arith.constant 0 : i32
    %c0_i32_0 = arith.constant 0 : i32
    %c0_i32_1 = arith.constant 0 : i32
    %c0_i32_2 = arith.constant 0 : i32
    return %c0_i32, %c0_i32_0, %c0_i32_1 : i32, i32, i32
  }
  func.func @transform_6(%arg0: i32) -> (i32, i32, i32) {
    %c0_i32 = arith.constant 0 : i32
    %c0_i32_0 = arith.constant 0 : i32
    %c0_i32_1 = arith.constant 0 : i32
    %c0_i32_2 = arith.constant 0 : i32
    return %c0_i32, %c0_i32_0, %c0_i32_1 : i32, i32, i32
  }
  func.func @transform_7(%arg0: i32) -> (i32, i32, i32) {
    %c0_i32 = arith.constant 0 : i32
    %c0_i32_0 = arith.constant 0 : i32
    %c0_i32_1 = arith.constant 0 : i32
    %c0_i32_2 = arith.constant 0 : i32
    return %c0_i32, %c0_i32_0, %c0_i32_1 : i32, i32, i32
  }
  func.func @transform_8(%arg0: i32) -> (i32, i32, i32) {
    %c0_i32 = arith.constant 0 : i32
    %c0_i32_0 = arith.constant 0 : i32
    %c0_i32_1 = arith.constant 0 : i32
    %c0_i32_2 = arith.constant 0 : i32
    return %c0_i32, %c0_i32_0, %c0_i32_1 : i32, i32, i32
  }
  func.func @transform_9(%arg0: i32) -> (i32, i32, i32) {
    %c0_i32 = arith.constant 0 : i32
    %c0_i32_0 = arith.constant 0 : i32
    %c0_i32_1 = arith.constant 0 : i32
    %c0_i32_2 = arith.constant 0 : i32
    return %c0_i32, %c0_i32_0, %c0_i32_1 : i32, i32, i32
  }
  func.func @transform_10(%arg0: i32) -> (i32, i32) {
    %c0_i32 = arith.constant 0 : i32
    %c0_i32_0 = arith.constant 0 : i32
    %c0_i32_1 = arith.constant 0 : i32
    return %c0_i32, %c0_i32_0 : i32, i32
  }
  func.func @transform_11(%arg0: i32) -> (i32, i32, i32) {
    %c0_i32 = arith.constant 0 : i32
    %c0_i32_0 = arith.constant 0 : i32
    %c0_i32_1 = arith.constant 0 : i32
    return %arg0, %c0_i32, %c0_i32_0 : i32, i32, i32
  }
}

</mosaic_0001>

<bundles_post_ra>
// kernel: mha_forward.1
= control target key start
LH: loop header
LB: loop body
LE: loop exit
PB: predicated region body
PF: predicated region fallthrough
CT: control target
= control target key end

     0   :  { %s1838_s0 = inlined_call_operand.vmem [shape: f32[2,8,32], index: 0, kind: input, shape index: {}]   ;;  %s1839_s1 = inlined_call_operand.vmem [shape: f32[2,8,32], index: 1, kind: input, shape index: {}]   ;;  %s1840_s2 = inlined_call_operand.vmem [shape: f32[2,8,32], index: 2, kind: input, shape index: {}]   ;;  %s1841_s3 = inlined_call_operand.vmem [shape: f32[4,32,8], index: 3, kind: input, shape index: {}]   ;;  %s1842_s4 = inlined_call_operand.vmem [shape: f32[4,1,8], index: 4, kind: input, shape index: {}]   ;;  %s1843_s5 = inlined_call_operand.vmem [shape: f32[4,32,8], index: 5, kind: input, shape index: {}]   ;;  %s1844_s6 = inlined_call_operand.vmem [shape: f32[4,1,8], index: 6, kind: input, shape index: {}]   ;;  %s1845_s7 = inlined_call_operand.vmem [shape: f32[4,32,8], index: 7, kind: input, shape index: {}]   ;;  %s1846_s8 = inlined_call_operand.vmem [shape: f32[4,1,8], index: 8, kind: input, shape index: {}]   ;;  %s1847_s9 = inlined_call_operand.vmem [shape: f32[4,8,32], index: 9, kind: input, shape index: {}]   ;;  %s1848_s10 = inlined_call_operand.vmem [shape: f32[1,32], index: 10, kind: input, shape index: {}]   ;;  %s1849_s11 = inlined_call_operand.hbm [shape: f32[2,8,32], index: 11, kind: output, shape index: {}]  }
   0x1   :  { %1850 = sst [smem:[#allocation6_spill]] %s1838_s0 }
   0x2   :  { %16 = vsyncpa [#allocation3], 0 }
   0x3   :  { %18 = vsyncpa [#allocation3 + $0x1], 0  ;;  %s1498_s17 = smov 0   ;;  %s1500_s18 = smov 0  }
   0x4   :  { %s1502_s19 = smov 0   ;;  %s1504_s20 = smov 0  }
   0x5 LB: > { %s1519_s21 = sadd.s32 4294967295, %s1436_s20   ;;  %s1266_s22 = sadd.s32 4294967294, %s1436_s20   ;;  %s1436_s20 = sphi %s1504_s20, %s1859_s20   ;;  %s1432_s19 = sphi %s1502_s19, %s1858_s19   ;;  %s1428_s18 = sphi %s1500_s18, %s1857_s18   ;;  %s1424_s17 = sphi %s1498_s17, %s1856_s17  }
   0x6   : > { %s1523_s23 = sadd.s32 1, %s1436_s20   ;;  %s277_s24 = sadd.s32 1, %s1432_s19 }
   0x7   : > { %s274_s25 = ssub.s32 %s1436_s20, %s1523_s23  ;;  %p287_p0 = scmp.ne.s32.totalorder %s1432_s19, %s1428_s18 }
   0x8   : > { %p275_p1 = scmp.eq.s32.totalorder %s274_s25, 0  ;;  %p288_p2 = scmp.eq.s32.totalorder %s1519_s21, 1 }
   0x9   : > { %p293_p3 = scmp.ne.s32.totalorder %s1428_s18, %s1424_s17  ;;  %p294_p4 = scmp.eq.s32.totalorder %s1266_s22, 1 }
   0xa   : > { %s1534_s26 = scalar_select %p275_p1, %s1432_s19, %s277_s24  }
   0xb   : > { %p1536_p5 = por %p288_p2, %p287_p0  ;;  %p1540_p6 = por %p294_p4, %p293_p3 }
   0xc   : > { %1851 = sst [smem:[#allocation5_spill]] %s1534_s26  ;;  %p1269_p7 = scmp.ge.s32.totalorder %s1436_s20, 1 }
   0xd   : > { %p357_p8 = scmp.lt.s32.totalorder %s1436_s20, 3 }
   0xf   : > { %p358_p9 = pnand %p1269_p7, %p357_p8 }
  0x10   : > { %p404_p10 = scmp.lt.s32.totalorder (!%p358_p9), %s1519_s21, 1  ;;  %s1854_s0 = sld [smem:[#allocation6_spill]] (!%p358_p9) }
  0x11   : > { %361 = sbr.rel (%p358_p9) target bundleno = 853 (0x355), region = 64  ;;  %s401_s16 = sand.u32 (!%p358_p9), 1, %s1428_s18  }
  0x12   : > { %s1270_s22 = sshll.u32 (!%p358_p9), %s401_s16, 3  ;;  %s1168_s15 = scalar_lea.sflag (!%p358_p9), [#allocation3], %s401_s16 }
  0x13   : > { %s403_s13 = scalar_lea.vmem (!%p358_p9), [#allocation2], %s1270_s22  ;;  %s1394_s22 = scalar_lea.hbm (!%p358_p9), %s1849_s11, 16 }
  0x16   : > { %v422_v0 = vld [vmem:[%s1841_s3 + $0x18] sm:$0xff]  ;;  %v421_v3 = vld [vmem:[%s1841_s3 + $0x10] sm:$0xff]  ;;  %v420_v6 = vld [vmem:[%s1841_s3 + $0x8] sm:$0xff]  ;;  %s405_s26 = scalar_select %p404_p10, %s1519_s21, 1  ;;  %vm451_vm0 = vcmask 261120   ;;  %vm765_vm1 = vcmask 64512  }
  0x17   : > { %v430_v1 = vld [vmem:[%s1841_s3 + $0x58] sm:$0xff]  ;;  %467 = vmatpush.msra.mxu0 %v422_v0  ;;  %v429_v4 = vld [vmem:[%s1841_s3 + $0x50] sm:$0xff]  ;;  %v428_v7 = vld [vmem:[%s1841_s3 + $0x48] sm:$0xff] }
  0x18   : > { %v434_v2 = vld [vmem:[%s1841_s3 + $0x78] sm:$0xff]  ;;  %507 = vmatpush.msra.mxu2 %v430_v1  ;;  %v433_v5 = vld [vmem:[%s1841_s3 + $0x70] sm:$0xff]  ;;  %v432_v8 = vld [vmem:[%s1841_s3 + $0x68] sm:$0xff]  ;;  %s1581_s12 = sshll.u32 %s405_s26, 3 }
  0x19   : > { %527 = vmatpush.msra.mxu3 %v434_v2  ;;  %468 = vmatpush.msra.mxu0 %v421_v3  ;;  %v419_v9 = vld [vmem:[%s1841_s3] sm:$0xff]  ;;  %v426_v11 = vld [vmem:[%s1841_s3 + $0x38] sm:$0xff]  ;;  %s407_s25 = scalar_lea.vmem %s1854_s0, %s1581_s12  ;;  %v425_v17 = vld [vmem:[%s1841_s3 + $0x30] sm:$0xff]  ;;  %s411_s0 = scalar_lea.vmem %s1839_s1, %s1581_s12 }
  0x1a   : > { %508 = vmatpush.msra.mxu2 %v429_v4  ;;  %v427_v10 = vld [vmem:[%s1841_s3 + $0x40] sm:$0xff]  ;;  %487 = vmatpush.msra.mxu1 %v426_v11  ;;  %v538_v14 = vld [vmem:[%s1843_s5 + $0x18] sm:$0xff]  ;;  %v537_v18 = vld [vmem:[%s1843_s5 + $0x10] sm:$0xff]  ;;  %s415_s30 = scalar_lea.vmem %s1840_s2, %s1581_s12  ;;  %s1303_s12 = sshll.u32 %s1519_s21, 3 }
  0x1b   : > { %528 = vmatpush.msra.mxu3 %v433_v5  ;;  %469 = vmatpush.msra.mxu0 %v420_v6  ;;  %v431_v12 = vld [vmem:[%s1841_s3 + $0x60] sm:$0xff]  ;;  %v546_v15 = vld [vmem:[%s1843_s5 + $0x58] sm:$0xff]  ;;  %v545_v19 = vld [vmem:[%s1843_s5 + $0x50] sm:$0xff]  ;;  %s1178_s26 = scalar_lea.hbm %s1849_s11, %s1303_s12  ;;  %s1180_s21 = sshll.u32 %s403_s13, 4  ;;  %s1181_s21 = int_to_ptr.vmem [resolvable:$true] %s1180_s21 }
  0x1c   : > { %509 = vmatpush.msra.mxu2 %v428_v7  ;;  %v416_v13 = vld [vmem:[%s407_s25] sm:$0xff]  ;;  %v550_v16 = vld [vmem:[%s1843_s5 + $0x78] sm:$0xff]  ;;  %v549_v20 = vld [vmem:[%s1843_s5 + $0x70] sm:$0xff]  ;;  %488 = vmatpush.msra.mxu1 %v425_v17  ;;  %s1182_s14 = sshll.u32 %s1178_s26, 4  ;;  %s1183_s14 = int_to_ptr.hbm [resolvable:$true] %s1182_s14 }
  0x1d   : > { %529 = vmatpush.msra.mxu3 %v432_v8  ;;  %470 = vmatpush.msra.mxu0 %v419_v9  ;;  %v424_v21 = vld [vmem:[%s1841_s3 + $0x28] sm:$0xff]  ;;  %v423_v25 = vld [vmem:[%s1841_s3 + $0x20] sm:$0xff]  ;;  %v542_v30 = vld [vmem:[%s1843_s5 + $0x38] sm:$0xff] }
  0x1e   : > { %510 = vmatpush.msra.mxu2 %v427_v10  ;;  %1274 = vmatmul.msk.f32.vlgmr.msra.gmra.mxu0 %vm451_vm0, %v416_v13  ;;  %v536_v22 = vld [vmem:[%s1843_s5 + $0x8] sm:$0xff]  ;;  %v535_v26 = vld [vmem:[%s1843_s5] sm:$0xff]  ;;  %v653_v31 = vld [vmem:[%s1845_s7 + $0x18] sm:$0xff] }
  0x1f   : > { %530 = vmatpush.msra.mxu3 %v431_v12  ;;  %1276 = vmatmul.msk.f32.vlgmr.msra.gmra.mxu2 %vm451_vm0, %v416_v13  ;;  %v544_v23 = vld [vmem:[%s1843_s5 + $0x48] sm:$0xff]  ;;  %v543_v27 = vld [vmem:[%s1843_s5 + $0x40] sm:$0xff]  ;;  %v541_v32 = vld [vmem:[%s1843_s5 + $0x30] sm:$0xff] }
  0x20   : > { %1277 = vmatmul.msk.f32.vlgmr.msra.gmra.mxu3 %vm451_vm0, %v416_v13  ;;  %582 = vmatpush.msrb.mxu0 %v538_v14  ;;  %v548_v24 = vld [vmem:[%s1843_s5 + $0x68] sm:$0xff]  ;;  %v547_v28 = vld [vmem:[%s1843_s5 + $0x60] sm:$0xff]  ;;  %v652_v35 = vld [vmem:[%s1845_s7 + $0x10] sm:$0xff] }
  0x21   : > { %622 = vmatpush.msrb.mxu2 %v546_v15  ;;  %642 = vmatpush.msrb.mxu3 %v550_v16  ;;  %v417_v29 = vld [vmem:[%s411_s0] sm:$0xff]  ;;  %v540_v33 = vld [vmem:[%s1843_s5 + $0x28] sm:$0xff]  ;;  %v661_v37 = vld [vmem:[%s1845_s7 + $0x58] sm:$0xff]  ;;  %s1388_s0 = sshra.s32 %s1183_s14, 4  ;;  %s1389_s0 = int_to_ptr.hbm [resolvable:$true] %s1388_s0 }
  0x22   : > { %583 = vmatpush.msrb.mxu0 %v537_v18  ;;  %489 = vmatpush.msra.mxu1 %v424_v21  ;;  %v539_v34 = vld [vmem:[%s1843_s5 + $0x20] sm:$0xff]  ;;  %v651_v36 = vld [vmem:[%s1845_s7 + $0x8] sm:$0xff]  ;;  %v665_v38 = vld [vmem:[%s1845_s7 + $0x78] sm:$0xff]  ;;  %s1390_s12 = scalar_lea.hbm %s1389_s0, 8  ;;  %p1395_p0 = scmp.lt.s32.totalorder %s1389_s0, %s1849_s11 }
  0x23   : > { %623 = vmatpush.msrb.mxu2 %v545_v19  ;;  %643 = vmatpush.msrb.mxu3 %v549_v20  ;;  %v650_v39 = vld [vmem:[%s1845_s7] sm:$0xff]  ;;  %v657_v41 = vld [vmem:[%s1845_s7 + $0x38] sm:$0xff]  ;;  %v660_v42 = vld [vmem:[%s1845_s7 + $0x50] sm:$0xff]  ;;  %p1391_p11 = scmp.ne.s32.totalorder %s1389_s0, %s1390_s12  ;;  %p1396_p1 = scmp.lt.s32.totalorder %s1394_s22, %s1390_s12 }
  0x24   : > { %584 = vmatpush.msrb.mxu0 %v536_v22  ;;  %490 = vmatpush.msra.mxu1 %v423_v25  ;;  %v418_v40 = vld [vmem:[%s415_s30] sm:$0xff]  ;;  %v664_v43 = vld [vmem:[%s1845_s7 + $0x70] sm:$0xff]  ;;  %v659_v45 = vld [vmem:[%s1845_s7 + $0x48] sm:$0xff] }
  0x25   : > { %624 = vmatpush.msrb.mxu2 %v544_v23  ;;  %644 = vmatpush.msrb.mxu3 %v548_v24  ;;  %v656_v44 = vld [vmem:[%s1845_s7 + $0x30] sm:$0xff]  ;;  %v663_v46 = vld [vmem:[%s1845_s7 + $0x68] sm:$0xff]  ;;  %v658_v48 = vld [vmem:[%s1845_s7 + $0x40] sm:$0xff]  ;;  %p1392_p12 = pnand %p1391_p11, %p1536_p5  ;;  %p1397_p2 = por %p1396_p1, %p1395_p0 }
  0x26   : > { %585 = vmatpush.msrb.mxu0 %v535_v26  ;;  %1275 = vmatmul.msk.f32.vlgmr.msra.gmra.mxu1 %vm451_vm0, %v416_v13  ;;  %v655_v47 = vld [vmem:[%s1845_s7 + $0x28] sm:$0xff]  ;;  %v662_v49 = vld [vmem:[%s1845_s7 + $0x60] sm:$0xff] }
  0x27   : > { %625 = vmatpush.msrb.mxu2 %v543_v27  ;;  %645 = vmatpush.msrb.mxu3 %v547_v28  ;;  %v654_v50 = vld [vmem:[%s1845_s7 + $0x20] sm:$0xff]  ;;  %p1393_p13 = pneg %p1392_p12 }
  0x28   : > { %1278 = vmatmul.msk.f32.vlgmr.msrb.gmra.mxu0 %vm451_vm0, %v417_v29  ;;  %1280 = vmatmul.msk.f32.vlgmr.msrb.gmra.mxu2 %vm451_vm0, %v417_v29  ;;  %v1349_v54 = vld [vmem:[%s1844_s6] ss:$0 sm:$0xff]  ;;  %v1350_v60 = vld [vmem:[%s1844_s6 + $0x2] ss:$0 sm:$0xff]  ;;  %v1351_v61 = vld [vmem:[%s1844_s6 + $0x3] ss:$0 sm:$0xff] }
  0x29   : > { %1281 = vmatmul.msk.f32.vlgmr.msrb.gmra.mxu3 %vm451_vm0, %v417_v29  ;;  %602 = vmatpush.msrb.mxu1 %v542_v30  ;;  %v1345_v55 = vld [vmem:[%s1842_s4] ss:$0 sm:$0xff]  ;;  %v1352_v62 = vld [vmem:[%s1844_s6 + $0x1] ss:$0 sm:$0xff]  ;;  %v1346_v63 = vld [vmem:[%s1842_s4 + $0x2] ss:$0 sm:$0xff]  ;;  %p1398_p3 = pnand %p1397_p2, %p1393_p13 }
  0x2a   : > { %697 = vmatpush.msra.mxu0 %v653_v31  ;;  %737 = vmatpush.msra.mxu2 %v661_v37  ;;  %v1348_v0 = vld [vmem:[%s1842_s4 + $0x1] ss:$0 sm:$0xff]  ;;  %v1347_v2 = vld [vmem:[%s1842_s4 + $0x3] ss:$0 sm:$0xff]  ;;  %v1353_v11 = vld [vmem:[%s1846_s8] ss:$0 sm:$0xff] }
  0x2b   : > { %603 = vmatpush.msrb.mxu1 %v541_v32  ;;  %757 = vmatpush.msra.mxu3 %v665_v38  ;;  %v1354_v14 = vld [vmem:[%s1846_s8 + $0x1] ss:$0 sm:$0xff]  ;;  %v1355_v17 = vld [vmem:[%s1846_s8 + $0x2] ss:$0 sm:$0xff]  ;;  %v1356_v18 = vld [vmem:[%s1846_s8 + $0x3] ss:$0 sm:$0xff] }
  0x2c   : > { %698 = vmatpush.msra.mxu0 %v652_v35  ;;  %738 = vmatpush.msra.mxu2 %v660_v42 }
  0x2d   : > { %604 = vmatpush.msrb.mxu1 %v540_v33  ;;  %758 = vmatpush.msra.mxu3 %v664_v43 }
  0x2e   : > { %699 = vmatpush.msra.mxu0 %v651_v36  ;;  %739 = vmatpush.msra.mxu2 %v659_v45 }
  0x2f   : > { %605 = vmatpush.msrb.mxu1 %v539_v34  ;;  %759 = vmatpush.msra.mxu3 %v663_v46 }
  0x30   : > { %1279 = vmatmul.msk.f32.vlgmr.msrb.gmra.mxu1 %vm451_vm0, %v417_v29  ;;  %700 = vmatpush.msra.mxu0 %v650_v39 }
  0x31   : > { %1282 = vmatmul.msk.f32.vlgmr.msra.gmra.mxu0 %vm451_vm0, %v418_v40  ;;  %717 = vmatpush.msra.mxu1 %v657_v41 }
  0x32   : > { %740 = vmatpush.msra.mxu2 %v658_v48  ;;  %760 = vmatpush.msra.mxu3 %v662_v49 }
  0x33   : > { %718 = vmatpush.msra.mxu1 %v656_v44  ;;  %1284 = vmatmul.msk.f32.vlgmr.msra.gmra.mxu2 %vm451_vm0, %v418_v40 }
  0x34   : > { %1285 = vmatmul.msk.f32.vlgmr.msra.gmra.mxu3 %vm451_vm0, %v418_v40 }
  0x35   : > { %719 = vmatpush.msra.mxu1 %v655_v47 }
  0x37   : > { %720 = vmatpush.msra.mxu1 %v654_v50 }
  0x38   : > { %1283 = vmatmul.msk.f32.vlgmr.msra.gmra.mxu1 %vm451_vm0, %v418_v40 }
  0x9b   : > { %v472_v51 = vpop.f32.mrf.mxu0 }
  0x9c   : > { %v473_v59 = vadd.f32 %v1345_v55, %v472_v51 }
  0xa2   : > { %v512_v52 = vpop.f32.mrf.mxu2 }
  0xa3   : > { %v532_v53 = vpop.f32.mrf.mxu3  ;;  %v492_v56 = vpop.f32.mrf.mxu1  ;;  %v513_v8 = vadd.f32 %v1346_v63, %v512_v52 }
  0xa4   : > { %v493_v9 = vadd.f32 %v1348_v0, %v492_v56  ;;  %v533_v10 = vadd.f32 %v1347_v2, %v532_v53 }
  0xa5   : > { %v587_v57 = vpop.f32.mrf.mxu0 }
  0xa6   : > { %v588_v58 = vadd.f32 %v1349_v54, %v587_v57 }
  0xa8   : > { %1286 = vmatpush.xpose.msk.msrb.mxu0 %vm765_vm1, %v588_v58 }
  0xab   : > { %v627_v1 = vpop.f32.mrf.mxu2  ;;  %1287 = vmatmul.msk.f32.vlgmr.msrb.gmra.mxu0 %vm765_vm1, %v473_v59 }
  0xac   : > { %v628_v3 = vadd.f32 %v1350_v60, %v627_v1  ;;  %v647_v4 = vpop.f32.mrf.mxu3 }
  0xad   : > { %v648_v5 = vadd.f32 %v1351_v61, %v647_v4  ;;  %v607_v6 = vpop.f32.mrf.mxu1 }
  0xae   : > { %v608_v7 = vadd.f32 %v1352_v62, %v607_v6  ;;  %1290 = vmatpush.xpose.msk.msrb.mxu2 %vm765_vm1, %v628_v3  ;;  %v702_v12 = vpop.f32.mrf.mxu0 }
  0xaf   : > { %1292 = vmatpush.xpose.msk.msrb.mxu3 %vm765_vm1, %v648_v5  ;;  %v703_v13 = vadd.f32 %v1353_v11, %v702_v12 }
  0xb0   : > { %1288 = vmatpush.xpose.msk.msrb.mxu1 %vm765_vm1, %v608_v7 }
  0xb1   : > { %1291 = vmatmul.msk.f32.vlgmr.msrb.gmra.mxu2 %vm765_vm1, %v513_v8  ;;  %984 = vmatpush.msra.mxu0 %v703_v13 }
  0xb2   : > { %1293 = vmatmul.msk.f32.vlgmr.msrb.gmra.mxu3 %vm765_vm1, %v533_v10 }
  0xb3   : > { %1289 = vmatmul.msk.f32.vlgmr.msrb.gmra.mxu1 %vm765_vm1, %v493_v9 }
  0xb5   : > { %v722_v15 = vpop.f32.mrf.mxu1 }
  0xb6   : > { %v723_v16 = vadd.f32 %v1354_v14, %v722_v15  ;;  %v742_v19 = vpop.f32.mrf.mxu2 }
  0xb7   : > { %v743_v20 = vadd.f32 %v1355_v17, %v742_v19  ;;  %v762_v21 = vpop.f32.mrf.mxu3 }
  0xb8   : > { %1007 = vmatpush.msra.mxu1 %v723_v16  ;;  %v763_v22 = vadd.f32 %v1356_v18, %v762_v21 }
  0xb9   : > { %1030 = vmatpush.msra.mxu2 %v743_v20 }
  0xba   : > { %1053 = vmatpush.msra.mxu3 %v763_v22 }
 0x128   : > { %v789_v23 = vpop.f32.mrf.mxu0 }
 0x129   : > { %v870_v24 = vsel %vm765_vm1, %v789_v23, -inf }
 0x12a   : > { %871 = vmax.xlane.f32.xlu1 %v870_v24 }
 0x130   : > { %v815_v25 = vpop.f32.mrf.mxu1 }
 0x131   : > { %v873_v26 = vsel %vm765_vm1, %v815_v25, -inf }
 0x132   : > { %874 = vmax.xlane.f32.xlu1 %v873_v26 }
 0x134   : > { %v841_v27 = vpop.f32.mrf.mxu2 }
 0x135   : > { %v876_v28 = vsel %vm765_vm1, %v841_v27, -inf  ;;  %v867_v29 = vpop.f32.mrf.mxu3 }
 0x136   : > { %877 = vmax.xlane.f32.xlu0 %v876_v28  ;;  %v879_v30 = vsel %vm765_vm1, %v867_v29, -inf }
 0x13e   : > { %880 = vmax.xlane.f32.xlu0 %v879_v30 }
 0x19d   : > { %v872_v31 = vpop.xlane.xlu1 %871 }
 0x19e   : > { %v882_v32 = vsub.f32 %v789_v23, %v872_v31 }
 0x1a0   : > { %v886_v33 = vmul.f32 1.442695, %v882_v32 }
 0x1a2   : > { %1358 = vpow2.f32 %v886_v33 }
 0x1a5   : > { %v875_v34 = vpop.xlane.xlu1 %874 }
 0x1a6   : > { %v883_v35 = vsub.f32 %v815_v25, %v875_v34 }
 0x1a8   : > { %v1359_v36 = vpop.eup %1358  ;;  %v888_v37 = vmul.f32 1.442695, %v883_v35  ;;  %v1058_v35 = vld [vmem:[%s1847_s9] sm:$0xff] }
 0x1a9   : > { %v878_v38 = vpop.xlane.xlu0 %877  ;;  %v894_v39 = vsel %vm765_vm1, %v1359_v36, 0.0  ;;  %1080 = vmatpush.msrb.mxu0 %v1058_v35 }
 0x1aa   : > { %1360 = vpow2.f32 %v888_v37  ;;  %v884_v40 = vsub.f32 %v841_v27, %v878_v38  ;;  %895 = vadd.xlane.f32.xlu0 %v894_v39  ;;  %v1060_v37 = vld [vmem:[%s1847_s9 + $0x10] sm:$0xff]  ;;  %v1061_v38 = vld [vmem:[%s1847_s9 + $0x18] sm:$0xff] }
 0x1ab   : > { %1126 = vmatpush.msrb.mxu2 %v1060_v37  ;;  %1149 = vmatpush.msrb.mxu3 %v1061_v38 }
 0x1ac   : > { %v890_v41 = vmul.f32 1.442695, %v884_v40 }
 0x1ae   : > { %1362 = vpow2.f32 %v890_v41 }
 0x1b0   : > { %v1361_v42 = vpop.eup %1360 }
 0x1b1   : > { %v881_v43 = vpop.xlane.xlu0 %880  ;;  %v897_v44 = vsel %vm765_vm1, %v1361_v42, 0.0 }
 0x1b2   : > { %v885_v45 = vsub.f32 %v867_v29, %v881_v43  ;;  %898 = vadd.xlane.f32.xlu1 %v897_v44 }
 0x1b4   : > { %v1768_v46 = vpop.eup %1362  ;;  %v892_v47 = vmul.f32 1.442695, %v885_v45 }
 0x1b5   : > { %v900_v48 = vsel %vm765_vm1, %v1768_v46, 0.0 }
 0x1b6   : > { %1364 = vpow2.f32 %v892_v47  ;;  %901 = vadd.xlane.f32.xlu2 %v900_v48 }
 0x1bc   : > { %v1772_v49 = vpop.eup %1364 }
 0x1bd   : > { %v903_v50 = vsel %vm765_vm1, %v1772_v49, 0.0 }
 0x1be   : > { %904 = vadd.xlane.f32.xlu2 %v903_v50 }
 0x21d   : > { %v896_v51 = vpop.xlane.xlu0 %895 }
 0x21e   : > { %1366 = vrcp.f32 %v896_v51  ;;  %v917_v56 = vand.u32 2147483648, %v896_v51  ;;  %v915_v58 = vand.u32 2147483647, %v896_v51  ;;  %vm911_vm3 = vweird.f32 %v896_v51 }
 0x220   : > { %v918_v62 = vor.u32 1.1754944e-38, %v917_v56  ;;  %vm916_vm5 = vcmp.eq.f32.partialorder %v915_v58, 8.507059e+37 }
 0x224   : > { %v1367_v52 = vpop.eup %1366 }
 0x225   : > { %v907_v53 = vmul.f32 %v1367_v52, %v896_v51  ;;  %v899_v54 = vpop.xlane.xlu1 %898  ;;  %vm912_vm2 = vweird.f32 %v1367_v52 }
 0x226   : > { %1368 = vrcp.f32 %v899_v54  ;;  %vm913_vm4 = vmor %vm911_vm3, %vm912_vm2  ;;  %v930_v5 = vand.u32 2147483647, %v899_v54  ;;  %v932_v6 = vand.u32 2147483648, %v899_v54  ;;  %vm926_vm7 = vweird.f32 %v899_v54 }
 0x227   : > { %v908_v55 = vsub.f32 1.0, %v907_v53 }
 0x228   : > { %vm931_vm9 = vcmp.eq.f32.partialorder %v930_v5, 8.507059e+37  ;;  %v933_v12 = vor.u32 1.1754944e-38, %v932_v6 }
 0x229   : > { %v909_v57 = vmul.f32 %v1367_v52, %v908_v55  ;;  %v902_v59 = vpop.xlane.xlu2 %901 }
 0x22a   : > { %1370 = vrcp.f32 %v902_v59  ;;  %v947_v13 = vand.u32 2147483648, %v902_v59  ;;  %v945_v16 = vand.u32 2147483647, %v902_v59  ;;  %vm941_vm11 = vweird.f32 %v902_v59 }
 0x22b   : > { %v910_v60 = vadd.f32 %v1367_v52, %v909_v57 }
 0x22c   : > { %v1369_v61 = vpop.eup %1368  ;;  %v948_v21 = vor.u32 1.1754944e-38, %v947_v13  ;;  %vm946_vm13 = vcmp.eq.f32.partialorder %v945_v16, 8.507059e+37 }
 0x22d   : > { %v914_v63 = vsel %vm913_vm4, %v1367_v52, %v910_v60  ;;  %v922_v0 = vmul.f32 %v1369_v61, %v899_v54  ;;  %vm927_vm6 = vweird.f32 %v1369_v61  ;;  %v1357_v52 = vld [vmem:[%s1848_s10] ss:$0 sm:$0xff] }
 0x22e   : > { %v919_v1 = vsel %vm916_vm5, %v918_v62, %v914_v63  ;;  %vm928_vm8 = vmor %vm926_vm7, %vm927_vm6 }
 0x22f   : > { %v920_v2 = vmul.f32 %v1359_v36, %v919_v1  ;;  %v923_v3 = vsub.f32 1.0, %v922_v0  ;;  %v1059_v36 = vld [vmem:[%s1847_s9 + $0x8] sm:$0xff] }
 0x230   : > { %v1371_v4 = vpop.eup %1370  ;;  %1103 = vmatpush.msrb.mxu1 %v1059_v36 }
 0x231   : > { %v924_v7 = vmul.f32 %v1369_v61, %v923_v3  ;;  %v937_v8 = vmul.f32 %v1371_v4, %v902_v59  ;;  %v905_v9 = vpop.xlane.xlu2 %904  ;;  %1294 = vmatmul.msk.f32.vlgmr.msra.gmra.mxu0 %vm765_vm1, %v920_v2  ;;  %vm942_vm10 = vweird.f32 %v1371_v4 }
 0x232   : > { %1372 = vrcp.f32 %v905_v9  ;;  %vm943_vm12 = vmor %vm941_vm11, %vm942_vm10  ;;  %v962_v27 = vand.u32 2147483648, %v905_v9  ;;  %v960_v29 = vand.u32 2147483647, %v905_v9  ;;  %vm956_vm15 = vweird.f32 %v905_v9 }
 0x233   : > { %v925_v10 = vadd.f32 %v1369_v61, %v924_v7  ;;  %v938_v11 = vsub.f32 1.0, %v937_v8 }
 0x234   : > { %v963_v31 = vor.u32 1.1754944e-38, %v962_v27  ;;  %vm961_vm3 = vcmp.eq.f32.partialorder %v960_v29, 8.507059e+37 }
 0x235   : > { %v929_v14 = vsel %vm928_vm8, %v1369_v61, %v925_v10  ;;  %v939_v15 = vmul.f32 %v1371_v4, %v938_v11 }
 0x236   : > { %v934_v17 = vsel %vm931_vm9, %v933_v12, %v929_v14 }
 0x237   : > { %v935_v18 = vmul.f32 %v1361_v42, %v934_v17  ;;  %v940_v19 = vadd.f32 %v1371_v4, %v939_v15 }
 0x238   : > { %v1373_v20 = vpop.eup %1372 }
 0x239   : > { %v944_v22 = vsel %vm943_vm12, %v1371_v4, %v940_v19  ;;  %v952_v23 = vmul.f32 %v1373_v20, %v905_v9  ;;  %1295 = vmatmul.msk.f32.vlgmr.msra.gmra.mxu1 %vm765_vm1, %v935_v18  ;;  %vm957_vm14 = vweird.f32 %v1373_v20 }
 0x23a   : > { %v949_v24 = vsel %vm946_vm13, %v948_v21, %v944_v22  ;;  %vm958_vm2 = vmor %vm956_vm15, %vm957_vm14 }
 0x23b   : > { %v953_v25 = vsub.f32 1.0, %v952_v23  ;;  %v950_v26 = vmul.f32 %v1768_v46, %v949_v24 }
 0x23d   : > { %v954_v28 = vmul.f32 %v1373_v20, %v953_v25  ;;  %1296 = vmatmul.msk.f32.vlgmr.msra.gmra.mxu2 %vm765_vm1, %v950_v26 }
 0x23f   : > { %v955_v30 = vadd.f32 %v1373_v20, %v954_v28 }
 0x241   : > { %v959_v32 = vsel %vm958_vm2, %v1373_v20, %v955_v30 }
 0x242   : > { %v964_v33 = vsel %vm961_vm3, %v963_v31, %v959_v32 }
 0x243   : > { %v965_v34 = vmul.f32 %v1772_v49, %v964_v33 }
 0x245   : > { %1297 = vmatmul.msk.f32.vlgmr.msra.gmra.mxu3 %vm765_vm1, %v965_v34 }
 0x2ae   : > { %v986_v39 = vpop.f32.mrf.mxu0 }
 0x2af   : > { %1298 = vmatmul.msk.f32.vlgmr.msrb.gmra.mxu0 %vm765_vm1, %v986_v39 }
 0x2b6   : > { %v1009_v40 = vpop.f32.mrf.mxu1 }
 0x2b7   : > { %1299 = vmatmul.msk.f32.vlgmr.msrb.gmra.mxu1 %vm765_vm1, %v1009_v40 }
 0x2c0   : > { %v1032_v41 = vpop.f32.mrf.mxu2 }
 0x2c1   : > { %1300 = vmatmul.msk.f32.vlgmr.msrb.gmra.mxu2 %vm765_vm1, %v1032_v41 }
 0x2c8   : > { %v1055_v42 = vpop.f32.mrf.mxu3 }
 0x2c9   : > { %1301 = vmatmul.msk.f32.vlgmr.msrb.gmra.mxu3 %vm765_vm1, %v1055_v42 }
 0x32c   : > { %v1082_v44 = vpop.f32.mrf.mxu0 }
 0x32d   : > { %v1154_v47 = vsel %vm451_vm0, %v1082_v44, 0.0 }
 0x334   : > { %v1105_v43 = vpop.f32.mrf.mxu1 }
 0x335   : > { %v1155_v46 = vsel %vm451_vm0, %v1105_v43, 0.0 }
 0x336   : > { %v1156_v49 = vadd.f32 %v1155_v46, %v1154_v47 }
 0x344   : > { %v1128_v45 = vpop.f32.mrf.mxu2 }
 0x345   : > { %v1157_v48 = vsel %vm451_vm0, %v1128_v45, 0.0 }
 0x346   : > { %v1158_v50 = vadd.f32 %v1157_v48, %v1156_v49 }
 0x34c   : > { %v1151_v51 = vpop.f32.mrf.mxu3 }
 0x34d   : > { %v1159_v53 = vsel %vm451_vm0, %v1151_v51, 0.0 }
 0x34e   : > { %v1160_v54 = vadd.f32 %v1159_v53, %v1158_v50 }
 0x350   : > { %v1165_v55 = vadd.f32 %v1357_v52, %v1160_v54 }
 0x352   : > { %1166 = vst.msk [vmem:[%s403_s13] sm:$0xff] %vm451_vm0, %v1165_v55 }
 0x353   : > { %1401 = shalt.err (!%p1398_p3)
}
 0x354   : > { %1306 = dma.vmem_to_hbm [thread:$0]  (%p1536_p5), %s1181_s21, 128, %s1183_s14, %s1168_s15  }
 0x355 PF: > { %p1312_p4 = scmp.ge.s32.totalorder %s1436_s20, 2  ;;  %s1194_s16 = sand.u32 1, %s1424_s17  }
 0x356   : > { %s1195_s30 = scalar_lea.sflag [#allocation3], %s1194_s16 }
 0x357   : > { %p1309_p7 = pnand %p1312_p4, %p1540_p6 }
 0x359   : > { %p1310_p8 = pneg %p1309_p7 }
 0x35b   : > { %1419 = dma.done.wait (%p1310_p8), %s1195_s30, 128  }
 0x35c   : > { %1421 = vsyncadd (%p1310_p8), %s1195_s30, 4294967168  ;;  %s1855_s13 = sld [smem:[#allocation5_spill]]  ;;  %p21_p9 = scmp.ge.s32.totalorder %s1523_s23, 4  }
 0x35d   : > { %s1856_s17 = smov %s1428_s18  ;;  %s1857_s18 = smov %s1432_s19 }
 0x35e   : > { %s1859_s20 = smov %s1523_s23  ;;  %23 = sbr.rel (!%p21_p9) target bundleno = 5 (0x5), region = 105 }
 0x362   : > { %s1858_s19 = smov %s1855_s13 }
 0x363   :  { %1201 = vsyncpa [#allocation3], 1 }
 0x364   :  { %1203 = vsyncpa [#allocation3 + $0x1], 1 }

</bundles_post_ra>
